<compile_context>
chip_gen: v6e
topology: v6e:2x2x1
jax: 0.10.0
libtpu: 0.0.40
codegen_flags: <defaults>
</compile_context>

<pallas_src>
import functools

import jax
import jax.numpy as jnp
from jax import lax
from jax.experimental import pallas as pl
from jax.experimental.pallas import tpu as pltpu


def _dice_partial_kernel(score_ref, target_ref, part_ref, *,
                         use_softmax, hw, tile, needs_mask):
    """One grid step: reduce a (Bb, C, TILE) score block and a (Bb, 1, TILE)
    int32 label block to per-class partial sums [intersect, z_sum, y_sum]."""
    s = score_ref[...].astype(jnp.float32)        # (Bb, C, TILE)
    t = target_ref[...]                            # (Bb, 1, TILE) int32

    valid = None
    if needs_mask:
        # Lane-validity for the ragged tail tile (the block may read lanes
        # past the true pixel count; their contents are unspecified).
        lane = lax.broadcasted_iota(jnp.int32, s.shape, 2)
        valid = (lane + pl.program_id(1) * tile) < hw          # (Bb, C, TILE)
        s = jnp.where(valid, s, 0.0)

    if use_softmax:
        # Manual softmax over the class axis.  (Set approx=True to push the
        # divide onto the EUP at ~1e-3 relative cost; exact kept for parity.)
        m = jnp.max(s, axis=1, keepdims=True)
        e = jnp.exp(s - m)
        denom = jnp.sum(e, axis=1, keepdims=True)
        s = e * pl.reciprocal(denom, approx=False)
        if needs_mask:
            s = jnp.where(valid, s, 0.0)

    class_ids = lax.broadcasted_iota(jnp.int32, s.shape, 1)    # (Bb, C, TILE)
    onehot = t == class_ids
    if needs_mask:
        onehot = jnp.logical_and(onehot, valid)
    onehot = onehot.astype(jnp.float32)

    # Per-class partial sums over (batch-fold, pixel) axes -> (C, 1) each.
    inter = jnp.sum(jnp.sum(s * onehot, axis=2, keepdims=True), axis=0)
    z_sum = jnp.sum(jnp.sum(s * s, axis=2, keepdims=True), axis=0)
    y_sum = jnp.sum(jnp.sum(onehot, axis=2, keepdims=True), axis=0)

    # Single (C, 3) store: place the three stats along the lane axis with a
    # broadcast + select instead of three masked sliver stores.
    col = lax.broadcasted_iota(jnp.int32, part_ref.shape[2:], 1)   # (C, 3)
    part_ref[0, 0, :, :] = jnp.where(col == 0, inter,
                                     jnp.where(col == 1, z_sum, y_sum))


def dice_loss(inputs, target, n_classes, weight=None, softmax=False,
              tile_hw=131072, vmem_budget_bytes=24 * 1024 * 1024,
              bf16_scores=False):
    """Pallas DiceLoss forward. inputs: (B, C, H, W); target: (B, H, W)."""
    B, C, H, W = inputs.shape
    assert C == n_classes, "channel dim must equal n_classes"
    if weight is None:
        weight = [1.0] * n_classes
    w = jnp.asarray([float(x) for x in weight], jnp.float32)

    hw = H * W
    score = inputs.reshape(B, C, hw)            # free reshape, no HBM transpose
    if bf16_scores:
        score = score.astype(jnp.bfloat16)      # halve the dominant HBM stream
    tgt = target.reshape(B, 1, hw).astype(jnp.int32)

    score_bytes = jnp.dtype(score.dtype).itemsize
    hw128 = pl.cdiv(hw, 128) * 128
    # Bytes per pixel column in one pipeline buffer (scores + labels); the
    # Pallas pipeline double-buffers, hence the factor 2 below.
    col_bytes = C * score_bytes + 4
    budget_cols = max(128, vmem_budget_bytes // (2 * col_bytes))
    max_cols = max(128, min(int(tile_hw), budget_cols))

    # v7x has 2 TensorCores: when B == 1, split the pixel axis so the parallel
    # grid has >= 2 steps instead of one tile swallowing the whole image.
    split_pixels = (B == 1) and (hw128 >= 256)

    if max_cols >= hw128 and not split_pixels:
        # Regime A: one tile spans the whole pixel axis -> no tail masking.
        # Fold batch elements per step so DMA blocks stay large for small H*W.
        tile = hw
        num_t = 1
        needs_mask = False
        bb = 1
        if B > 1:
            bb_cap = max(1, B // 2)      # keep >= 2 grid steps for megacore
            for d in range(1, bb_cap + 1):
                if B % d == 0 and d * hw128 <= max_cols:
                    bb = d
    else:
        # Regime B: tile the pixel axis with lane-aligned tiles; mask the
        # ragged tail in-kernel (no jnp.pad HBM copy).
        bb = 1
        cap = max_cols
        if split_pixels:
            cap = min(cap, ((hw128 // 2 + 127) // 128) * 128)
        tile = max(128, (cap // 128) * 128)
        tile = min(tile, hw128)
        num_t = pl.cdiv(hw, tile)
        needs_mask = (hw % tile) != 0

    kernel = functools.partial(
        _dice_partial_kernel, use_softmax=bool(softmax), hw=hw, tile=tile,
        needs_mask=needs_mask)

    partials = pl.pallas_call(
        kernel,
        out_shape=jax.ShapeDtypeStruct((B // bb, num_t, C, 3), jnp.float32),
        grid_spec=pltpu.PrefetchScalarGridSpec(
            num_scalar_prefetch=0,
            grid=(B // bb, num_t),
            in_specs=[
                pl.BlockSpec((bb, C, tile), lambda b, t: (b, 0, t)),
                pl.BlockSpec((bb, 1, tile), lambda b, t: (b, 0, t)),
            ],
            out_specs=pl.BlockSpec((1, 1, C, 3), lambda b, t: (b, t, 0, 0)),
        ),
        compiler_params=pltpu.CompilerParams(
            dimension_semantics=("parallel", "parallel"),
            vmem_limit_bytes=32 * 1024 * 1024),
    )(score, tgt)

    # Tiny epilogue: (B//bb, T, C, 3) -> (C, 3) -> scalar loss.
    stats = jnp.sum(partials, axis=(0, 1))
    intersect, z_sum, y_sum = stats[:, 0], stats[:, 1], stats[:, 2]
    smooth = jnp.float32(1e-5)
    dice = 1.0 - (2.0 * intersect + smooth) / (z_sum + y_sum + smooth)
    return jnp.sum(dice * w) / jnp.float32(n_classes)


def dice_loss_ref(inputs, target, n_classes, weight=None, softmax=False):
    """Pure-JAX reference mirroring the PyTorch module."""
    if softmax:
        inputs = jax.nn.softmax(inputs, axis=1)
    if weight is None:
        weight = [1.0] * n_classes
    target_oh = jnp.stack(
        [(target == i).astype(jnp.float32) for i in range(n_classes)], axis=1)
    smooth = 1e-5
    loss = 0.0
    for i in range(n_classes):
        s = inputs[:, i].astype(jnp.float32)
        t = target_oh[:, i]
        intersect = jnp.sum(s * t)
        y_sum = jnp.sum(t * t)
        z_sum = jnp.sum(s * s)
        dice = 1.0 - (2.0 * intersect + smooth) / (z_sum + y_sum + smooth)
        loss = loss + dice * weight[i]
    return loss / n_classes


if __name__ == "__main__":
    key = jax.random.PRNGKey(0)
    k1, k2, k3, k4, k5, k6 = jax.random.split(key, 6)

    # --- B=2, C=4, 16x16: full-image tile per batch element ----------------
    B, C, H, W = 2, 4, 16, 16
    logits = jax.random.normal(k1, (B, C, H, W), dtype=jnp.float32)
    labels = jax.random.randint(k2, (B, H, W), 0, C).astype(jnp.int32)
    probs = jax.nn.softmax(logits, axis=1)

    out = jax.block_until_ready(dice_loss(probs, labels, n_classes=C))
    ref = dice_loss_ref(probs, labels, n_classes=C)
    assert jnp.allclose(out, ref, rtol=1e-5, atol=1e-5), (out, ref)

    # softmax=True path (softmax computed inside the kernel).
    out_sm = jax.block_until_ready(
        dice_loss(logits, labels, n_classes=C, softmax=True))
    ref_sm = dice_loss_ref(logits, labels, n_classes=C, softmax=True)
    assert jnp.allclose(out_sm, ref_sm, rtol=1e-5, atol=1e-5), (out_sm, ref_sm)

    # bf16 score stream (stats still accumulated in f32 in-kernel).
    out_bf = jax.block_until_ready(
        dice_loss(probs, labels, n_classes=C, bf16_scores=True))
    ref_bf = dice_loss_ref(probs.astype(jnp.bfloat16).astype(jnp.float32),
                           labels, n_classes=C)
    assert jnp.allclose(out_bf, ref_bf, rtol=1e-5, atol=1e-5), (out_bf, ref_bf)

    # --- B=1, 24x24 (non-128-aligned): multi-tile grid + ragged-tail mask,
    #     class weights, in-kernel softmax; small tile forces several tiles.
    logits2 = jax.random.normal(k3, (1, C, 24, 24), dtype=jnp.float32)
    labels2 = jax.random.randint(k4, (1, 24, 24), 0, C).astype(jnp.int32)
    wts = [0.5, 1.0, 1.5, 2.0]
    out2 = jax.block_until_ready(
        dice_loss(logits2, labels2, n_classes=C, weight=wts, softmax=True,
                  tile_hw=256))
    ref2 = dice_loss_ref(logits2, labels2, n_classes=C, weight=wts,
                         softmax=True)
    assert jnp.allclose(out2, ref2, rtol=1e-5, atol=1e-5), (out2, ref2)

    # Same shape with default (large) tiles: exercises the B==1 pixel split.
    out2d = jax.block_until_ready(
        dice_loss(logits2, labels2, n_classes=C, weight=wts, softmax=True))
    assert jnp.allclose(out2d, ref2, rtol=1e-5, atol=1e-5), (out2d, ref2)

    # --- B=4, 8x8: small image -> batch-fold regime (Bb=2 per grid step) ---
    logits3 = jax.random.normal(k5, (4, C, 8, 8), dtype=jnp.float32)
    labels3 = jax.random.randint(k6, (4, 8, 8), 0, C).astype(jnp.int32)
    probs3 = jax.nn.softmax(logits3, axis=1)
    out3 = jax.block_until_ready(dice_loss(probs3, labels3, n_classes=C))
    ref3 = dice_loss_ref(probs3, labels3, n_classes=C)
    assert jnp.allclose(out3, ref3, rtol=1e-5, atol=1e-5), (out3, ref3)

    print("KERNEL_OK")
</pallas_src>

<mosaic_0001>
module attributes {stable_mosaic.version = 11 : i64} {
  func.func @_dice_partial_kernel(%arg0: i32, %arg1: i32, %arg2: memref<1x4x256xf32, #tpu.memory_space<vmem>>, %arg3: memref<1x1x256xi32, #tpu.memory_space<vmem>>, %arg4: memref<1x1x4x3xf32, #tpu.memory_space<vmem>>) attributes {dimension_semantics = [#tpu.dimension_semantics<parallel>, #tpu.dimension_semantics<parallel>], iteration_bounds = array<i64: 2, 1>, scalar_prefetch = 0 : i64, scratch_operands = 0 : i64, tpu.core_type = #tpu.core_type<tc>, window_params = [{transform_indices = @transform_0, window_bounds = array<i64: 1, 4, 256>}, {transform_indices = @transform_1, window_bounds = array<i64: 1, 1, 256>}, {transform_indices = @transform_2, window_bounds = array<i64: 1, 1, 4, 3>}]} {
    %c0 = arith.constant 0 : index
    %c0_0 = arith.constant 0 : index
    %c0_1 = arith.constant 0 : index
    %0 = vector.load %arg2[%c0, %c0_0, %c0_1] : memref<1x4x256xf32, #tpu.memory_space<vmem>>, vector<1x4x256xf32>
    %c0_2 = arith.constant 0 : index
    %c0_3 = arith.constant 0 : index
    %c0_4 = arith.constant 0 : index
    %1 = vector.load %arg3[%c0_2, %c0_3, %c0_4] : memref<1x1x256xi32, #tpu.memory_space<vmem>>, vector<1x1x256xi32>
    %2 = tpu.iota {dimensions = array<i32: 1>} : vector<1x4x256xi32>
    %3 = vector.broadcast %1 : vector<1x1x256xi32> to vector<1x4x256xi32>
    %4 = arith.cmpi eq, %3, %2 : vector<1x4x256xi32>
    %5 = arith.extui %4 : vector<1x4x256xi1> to vector<1x4x256xi32>
    %6 = arith.sitofp %5 : vector<1x4x256xi32> to vector<1x4x256xf32>
    %7 = arith.mulf %0, %6 : vector<1x4x256xf32>
    %cst = arith.constant dense<0.000000e+00> : vector<1x4xf32>
    %8 = vector.multi_reduction <add>, %7, %cst [2] : vector<1x4x256xf32> to vector<1x4xf32>
    %9 = vector.shape_cast %8 : vector<1x4xf32> to vector<1x4x1xf32>
    %cst_5 = arith.constant dense<0.000000e+00> : vector<4x1xf32>
    %10 = vector.multi_reduction <add>, %9, %cst_5 [0] : vector<1x4x1xf32> to vector<4x1xf32>
    %11 = arith.mulf %0, %0 : vector<1x4x256xf32>
    %cst_6 = arith.constant dense<0.000000e+00> : vector<1x4xf32>
    %12 = vector.multi_reduction <add>, %11, %cst_6 [2] : vector<1x4x256xf32> to vector<1x4xf32>
    %13 = vector.shape_cast %12 : vector<1x4xf32> to vector<1x4x1xf32>
    %cst_7 = arith.constant dense<0.000000e+00> : vector<4x1xf32>
    %14 = vector.multi_reduction <add>, %13, %cst_7 [0] : vector<1x4x1xf32> to vector<4x1xf32>
    %cst_8 = arith.constant dense<0.000000e+00> : vector<1x4xf32>
    %15 = vector.multi_reduction <add>, %6, %cst_8 [2] : vector<1x4x256xf32> to vector<1x4xf32>
    %16 = vector.shape_cast %15 : vector<1x4xf32> to vector<1x4x1xf32>
    %cst_9 = arith.constant dense<0.000000e+00> : vector<4x1xf32>
    %17 = vector.multi_reduction <add>, %16, %cst_9 [0] : vector<1x4x1xf32> to vector<4x1xf32>
    %18 = tpu.iota {dimensions = array<i32: 1>} : vector<4x3xi32>
    %c0_i32 = arith.constant 0 : i32
    %19 = vector.broadcast %c0_i32 : i32 to vector<4x3xi32>
    %20 = arith.cmpi eq, %18, %19 : vector<4x3xi32>
    %c1_i32 = arith.constant 1 : i32
    %21 = vector.broadcast %c1_i32 : i32 to vector<4x3xi32>
    %22 = arith.cmpi eq, %18, %21 : vector<4x3xi32>
    %23 = vector.shape_cast %14 : vector<4x1xf32> to vector<4x1xf32>
    %24 = vector.broadcast %23 : vector<4x1xf32> to vector<4x3xf32>
    %25 = vector.shape_cast %17 : vector<4x1xf32> to vector<4x1xf32>
    %26 = vector.broadcast %25 : vector<4x1xf32> to vector<4x3xf32>
    %27 = arith.select %22, %24, %26 : vector<4x3xi1>, vector<4x3xf32>
    %28 = vector.shape_cast %10 : vector<4x1xf32> to vector<4x1xf32>
    %29 = vector.broadcast %28 : vector<4x1xf32> to vector<4x3xf32>
    %30 = arith.select %20, %29, %27 : vector<4x3xi1>, vector<4x3xf32>
    %c0_10 = arith.constant 0 : index
    %c0_11 = arith.constant 0 : index
    %c0_12 = arith.constant 0 : index
    %c0_13 = arith.constant 0 : index
    %31 = vector.load %arg4[%c0_10, %c0_11, %c0_12, %c0_13] : memref<1x1x4x3xf32, #tpu.memory_space<vmem>>, vector<1x1x4x3xf32>
    %32 = vector.shape_cast %31 : vector<1x1x4x3xf32> to vector<4x3xf32>
    %33 = vector.shape_cast %30 : vector<4x3xf32> to vector<1x1x4x3xf32>
    tpu.vector_store %arg4[%c0_10, %c0_11, %c0_12, %c0_13], %33 {strides = array<i32>} : memref<1x1x4x3xf32, #tpu.memory_space<vmem>>, vector<1x1x4x3xf32>,
    return
  }
  func.func @transform_0(%arg0: i32, %arg1: i32) -> (i32, i32, i32) {
    %c0_i32 = arith.constant 0 : i32
    %c0_i32_0 = arith.constant 0 : i32
    return %arg0, %c0_i32, %arg1 : i32, i32, i32
  }
  func.func @transform_1(%arg0: i32, %arg1: i32) -> (i32, i32, i32) {
    %c0_i32 = arith.constant 0 : i32
    %c0_i32_0 = arith.constant 0 : i32
    return %arg0, %c0_i32, %arg1 : i32, i32, i32
  }
  func.func @transform_2(%arg0: i32, %arg1: i32) -> (i32, i32, i32, i32) {
    %c0_i32 = arith.constant 0 : i32
    %c0_i32_0 = arith.constant 0 : i32
    %c0_i32_1 = arith.constant 0 : i32
    return %arg0, %arg1, %c0_i32, %c0_i32_0 : i32, i32, i32, i32
  }
}

</mosaic_0001>

<bundles_post_ra>
// kernel: tpu_custom_call.1
= control target key start
LH: loop header
LB: loop body
LE: loop exit
PB: predicated region body
PF: predicated region fallthrough
CT: control target
= control target key end

     0   :  { %7 = vsyncpa [#allocation3], 0  ;;  %s742_s0 = inlined_call_operand.hbm [shape: f32[2,4,256], index: 0, kind: input, shape index: {}]   ;;  %s743_s1 = inlined_call_operand.hbm [shape: s32[2,1,256], index: 1, kind: input, shape index: {}]   ;;  %s744_s2 = inlined_call_operand.vmem [shape: f32[2,1,4,3], index: 2, kind: output, shape index: {}]  }
   0x1   :  { %9 = vsyncpa [#allocation3 + $0x1], 0 }
   0x2   :  { %10 = vsyncpa [#allocation5], 0 }
   0x3   :  { %12 = vsyncpa [#allocation5 + $0x1], 0  ;;  %s608_s9 = smov 0   ;;  %s610_s10 = smov 0  }
   0x4   :  { %s612_s11 = smov 0   ;;  %s614_s12 = smov 0  }
   0x5   :  { %s616_s13 = smov 0   ;;  %s618_s14 = smov 0  }
   0x6 LB: > { %s397_s15 = sadd.s32 4294967295, %s588_s14   ;;  %s30_s16 = sadd.s32 1, %s584_s13  ;;  %s588_s14 = sphi %s618_s14, %s18_s14   ;;  %s584_s13 = sphi %s616_s13, %s753_s13   ;;  %s580_s12 = sphi %s614_s12, %s752_s12   ;;  %s576_s11 = sphi %s612_s11, %s751_s11   ;;  %s572_s10 = sphi %s610_s10, %s750_s10   ;;  %s568_s9 = sphi %s608_s9, %s749_s9  }
   0x7   : > { %p32_p0 = scmp.ge.s32.totalorder %s30_s16, 2  ;;  %s39_s17 = sadd.s32 1, %s576_s11 }
   0x8   : > { %p46_p1 = scmp.ne.s32.totalorder %s576_s11, %s572_s10  ;;  %p47_p2 = scmp.eq.s32.totalorder %s588_s14, 0 }
   0x9   : > { %s755_s16 = smov (%p32_p0, %s30_s16), 0  ;;  %p52_p4 = scmp.ne.s32.totalorder %s572_s10, %s568_s9 }
   0xa   : > { %p644_p3 = por %p47_p2, %p46_p1  ;;  %s34_s19 = ssub.s32 %s584_s13, %s755_s16 }
   0xb   : > { %p53_p5 = scmp.eq.s32.totalorder %s397_s15, 0  ;;  %p37_p6 = scmp.eq.s32.totalorder %s34_s19, 0 }
   0xc   : > { %p428_p8 = scmp.lt.s32.totalorder %s588_s14, 2  ;;  %s660_s22 = sand.u32 1, %s576_s11  }
   0xd   : > { %p651_p7 = por %p53_p5, %p52_p4  ;;  %s415_s23 = sshll.u32 %s584_s13, 7 }
   0xe   : > { %s657_s21 = scalar_select %p37_p6, %s576_s11, %s39_s17  }
   0xf   : > { %s401_s24 = sshll.u32 %s660_s22, 3  ;;  %s144_s27 = scalar_lea.hbm %s742_s0, %s415_s23 }
  0x10   : > { %s136_s28 = scalar_lea.vmem [#allocation2], %s401_s24  ;;  %p669_p9 = pnand %p428_p8, %p644_p3 }
  0x11   : > { %s146_s29 = sshll.u32 %s136_s28, 4  ;;  %p407_p10 = scmp.ge.s32.totalorder %s588_s14, 1  ;;  %s147_s29 = int_to_ptr.vmem [resolvable:$true] %s146_s29 }
  0x12   : > { %p172_p11 = scmp.lt.s32.totalorder %s588_s14, 3  ;;  %s133_s3 = scalar_lea.sflag [#allocation3], %s660_s22 }
  0x13   : > { %p480_p12 = pneg %p669_p9  ;;  %s491_s4 = scalar_lea.vmem %s147_s29, 128 }
  0x14   : > { %p492_p13 = scmp.ne.s32.totalorder %s147_s29, %s491_s4  ;;  %s590_s5 = smov [#allocation2]  }
  0x15   : > { %s496_s6 = sshll.u32 %s590_s5, 4  ;;  %s497_s6 = int_to_ptr.vmem [resolvable:$false] %s496_s6 }
  0x16   : > { %p494_p0 = pnand %p492_p13, %p480_p12  ;;  %s498_s7 = scalar_lea.vmem %s497_s6, 256 }
  0x17   : > { %p499_p2 = scmp.lt.s32.totalorder %s147_s29, %s497_s6  ;;  %p500_p3 = scmp.lt.s32.totalorder %s498_s7, %s491_s4 }
  0x18   : > { %p495_p1 = pneg %p494_p0 }
  0x19   : > { %p501_p4 = por %p500_p3, %p499_p2 }
  0x1b   : > { %p502_p5 = pnand %p501_p4, %p495_p1 }
  0x1d   : > { %505 = shalt.err (!%p502_p5)
}
  0x1e   : > { %424 = dma.hbm_to_vmem [thread:$0]  (!%p669_p9), %s144_s27, 128, %s147_s29, %s133_s3  }
  0x1f   : > { %p687_p6 = pnand %p407_p10, %p172_p11  ;;  %s404_s9 = sshll.u32 %s660_s22, 1 }
  0x20   : > { %s416_s15 = sshll.u32 %s584_s13, 5  ;;  %s157_s23 = scalar_lea.vmem [#allocation4], %s404_s9 }
  0x21   : > { %s165_s19 = scalar_lea.hbm %s743_s1, %s416_s15  ;;  %s167_s24 = sshll.u32 %s157_s23, 4  ;;  %s168_s24 = int_to_ptr.vmem [resolvable:$true] %s167_s24 }
  0x22   : > { %s154_s25 = scalar_lea.sflag [#allocation5], %s660_s22  ;;  %s519_s26 = scalar_lea.vmem %s168_s24, 32 }
  0x23   : > { %p520_p8 = scmp.ne.s32.totalorder %s168_s24, %s519_s26  ;;  %s591_s27 = smov [#allocation4]  }
  0x24   : > { %s524_s28 = sshll.u32 %s591_s27, 4  ;;  %s525_s28 = int_to_ptr.vmem [resolvable:$false] %s524_s28 }
  0x25   : > { %p522_p13 = pnand %p520_p8, %p480_p12  ;;  %s526_s29 = scalar_lea.vmem %s525_s28, 64 }
  0x26   : > { %p527_p10 = scmp.lt.s32.totalorder %s168_s24, %s525_s28  ;;  %p528_p11 = scmp.lt.s32.totalorder %s526_s29, %s519_s26 }
  0x27   : > { %p523_p0 = pneg %p522_p13 }
  0x28   : > { %p529_p1 = por %p528_p11, %p527_p10 }
  0x2a   : > { %p530_p2 = pnand %p529_p1, %p523_p0 }
  0x2c   : > { %533 = shalt.err (!%p530_p2)
}
  0x2d   : > { %427 = dma.hbm_to_vmem [thread:$0]  (!%p669_p9), %s165_s19, 32, %s168_s24, %s154_s25  }
  0x2e   : > { %176 = sbr.rel (%p687_p6) target bundleno = 214 (0xd6), region = 28  ;;  %s178_s22 = sand.u32 (!%p687_p6), 1, %s572_s10  }
  0x2f   : > { %s408_s3 = sshll.u32 (!%p687_p6), %s178_s22, 3  ;;  %s179_s4 = scalar_lea.sflag (!%p687_p6), [#allocation3], %s178_s22 }
  0x30   : > { %s182_s5 = scalar_lea.vmem (!%p687_p6), [#allocation2], %s408_s3 }
  0x33   : > { %559 = dma.done.wait (%p651_p7), %s179_s4, 128  }
  0x34   : > { %561 = vsyncadd (%p651_p7), %s179_s4, 4294967168  ;;  %s409_s6 = sshll.u32 %s178_s22, 1  ;;  %s188_s7 = scalar_lea.sflag [#allocation5], %s178_s22 }
  0x35   : > { %s191_s9 = scalar_lea.vmem [#allocation4], %s409_s6 }
  0x36   : > { %563 = dma.done.wait (%p651_p7), %s188_s7, 32  }
  0x37   : > { %565 = vsyncadd (%p651_p7), %s188_s7, 4294967264  ;;  %v230_v0 = vlaneseq  ;;  %v228_v4 = vld [vmem:[%s182_s5] sm:$0xff]  ;;  %vm254_vm0 = vcmask 1043456   ;;  %v229_v5 = vld [vmem:[%s191_s9] sm:$0x3]  ;;  %v592_v11 = vmov 0.0  }
  0x38   : > { %v261_v6 = vmul.f32 %v228_v4, %v228_v4  ;;  %p221_p7 = scmp.lt.s32.totalorder %s580_s12, 1  ;;  %vm283_vm5 = vcmask 19456  }
  0x39   : > { %v231_v1 = vshrl.u32 %v230_v0, 7  ;;  %v278_v25 = vand.u32 127, %v230_v0 }
  0x3a   : > { %v263_v9 = vcombine.high %v261_v6, %v261_v6  ;;  %v265_v10 = vsel %vm254_vm0, %v261_v6, 0.0  ;;  %s757_s12 = smov (!%p221_p7, %s580_s12), 1 }
  0x3b   : > { %v234_v2 = vsub.s32 0, %v231_v1  ;;  %v238_v3 = vsub.s32 1, %v231_v1  ;;  %vm280_vm3 = vcmp.eq.s32.totalorder %v278_v25, 1  ;;  %s410_s20 = sshll.u32 %s757_s12, 2  ;;  %vm279_vm4 = vcmp.eq.s32.totalorder %v278_v25, 0 }
  0x3c   : > { %v266_v14 = vsel %vm254_vm0, %v263_v9, 0.0  ;;  %s227_s15 = scalar_lea.vmem %s744_s2, %s410_s20 }
  0x3d   : > { %v235_v7 = vrot.slane %v229_v5, %v234_v2  ;;  %v239_v8 = vrot.slane %v229_v5, %v238_v3  ;;  %v267_v18 = vadd.f32 %v266_v14, %v265_v10 }
  0x3f   : > { %vm240_vm1 = vcmp.eq.s32.totalorder %v235_v7, %v231_v1  ;;  %vm241_vm2 = vcmp.eq.s32.totalorder %v239_v8, %v231_v1  ;;  %268 = vadd.xlane.f32.xlu0 %v267_v18 }
  0x40   : > { %v411_v12 = vsel %vm240_vm1, 1.0, %v592_v11  ;;  %v412_v13 = vsel %vm241_vm2, 1.0, %v592_v11 }
  0x41   : > { %v248_v15 = vcombine.low %v411_v12, %v412_v13  ;;  %v271_v16 = vsel %vm254_vm0, %v411_v12, 0.0  ;;  %v272_v17 = vsel %vm254_vm0, %v412_v13, 0.0 }
  0x42   : > { %v273_v20 = vadd.f32 %v272_v17, %v271_v16 }
  0x43   : > { %v250_v19 = vmul.f32 %v248_v15, %v228_v4 }
  0x44   : > { %274 = vadd.xlane.f32.xlu0 %v273_v20 }
  0x45   : > { %v252_v21 = vcombine.high %v250_v19, %v250_v19  ;;  %v255_v22 = vsel %vm254_vm0, %v250_v19, 0.0 }
  0x47   : > { %v256_v23 = vsel %vm254_vm0, %v252_v21, 0.0 }
  0x48   : > { %v257_v24 = vadd.f32 %v256_v23, %v255_v22 }
  0x4a   : > { %258 = vadd.xlane.f32.xlu1 %v257_v24 }
  0xc8   : > { %v269_v26 = vpop.xlane.xlu0 %268 }
  0xcd   : > { %v275_v27 = vpop.xlane.xlu0 %274 }
  0xce   : > { %v281_v28 = vsel %vm280_vm3, %v269_v26, %v275_v27 }
  0xd3   : > { %v259_v29 = vpop.xlane.xlu1 %258 }
  0xd4   : > { %v282_v30 = vsel %vm279_vm4, %v259_v29, %v281_v28 }
  0xd5   : > { %284 = vst.msk [vmem:[%s227_s15] sm:$0xf] %vm283_vm5, %v282_v30 }
  0xd6 PF: > { %s18_s14 = sadd.s32 1, %s588_s14   ;;  %s749_s9 = smov %s572_s10 }
  0xd7   : > { %p15_p9 = scmp.ge.s32.totalorder %s18_s14, 4   ;;  %s750_s10 = smov %s576_s11 }
  0xd8   : > { %s751_s11 = smov %s657_s21  ;;  %s752_s12 = smov %s584_s13 }
  0xd9   : > { %s753_s13 = smov %s755_s16  ;;  %17 = sbr.rel (!%p15_p9) target bundleno = 6 (0x6), region = 81 }
  0xde   :  { %310 = vsyncpa [#allocation3], 1 }
  0xdf   :  { %312 = vsyncpa [#allocation3 + $0x1], 1 }
  0xe0   :  { %313 = vsyncpa [#allocation5], 1 }
  0xe1   :  { %315 = vsyncpa [#allocation5 + $0x1], 1 }

</bundles_post_ra>
